<compile_context>
chip_gen: v5e
topology: v5e:2x2
jax: 0.10.0
libtpu: 0.0.40
codegen_flags: <defaults>
</compile_context>

<pallas_src>
import functools

import jax
import jax.numpy as jnp
from jax.experimental import pallas as pl
from jax.experimental.pallas import tpu as pltpu

_NEG_PAD = -1e9  # bias fill for padded bottleneck lanes (killed by softmax)


# -----------------------------------------------------------------------------
# Kernel: one grid step == one (TM, *) row tile of the flattened (B*T, D) input.
# Fuses MLP -> bottleneck -> gumbel-softmax -> decoder[0] in a single pass.
# -----------------------------------------------------------------------------
def _gumbel_mlp_kernel(itemp_ref, x_ref, g_ref,
                       w1_ref, b1_ref, w2_ref, b2_ref,
                       wb_ref, bb_ref, wd_ref, bd_ref,
                       *out_refs, return_feat):
    if return_feat:
        logits_ref, out_ref, enc_ref, embed_ref = out_refs
    else:
        logits_ref, out_ref = out_refs
        enc_ref = embed_ref = None

    x = x_ref[...]                                             # (TM, Dp) bf16

    # embed = ReLU(Linear2(ReLU(Linear1(x)))) -- f32 accumulation on the MXU.
    h = jnp.dot(x, w1_ref[...], preferred_element_type=jnp.float32)
    h = jnp.maximum(h + b1_ref[...], 0.0).astype(x.dtype)
    h = jnp.dot(h, w2_ref[...], preferred_element_type=jnp.float32)
    h = jnp.maximum(h + b2_ref[...], 0.0)                      # (TM, Kp) f32
    if return_feat:
        embed_ref[...] = h.astype(embed_ref.dtype)

    # logits = bottleneck(embed); padded lanes carry a -1e9 bias so they
    # vanish under the softmax.
    logits = jnp.dot(h.astype(wb_ref.dtype), wb_ref[...],
                     preferred_element_type=jnp.float32) + bb_ref[...]
    logits_ref[...] = logits.astype(logits_ref.dtype)

    # Soft gumbel-softmax sample (F.gumbel_softmax, hard=False default).
    # Gumbel(0,1) noise is streamed in (g_ref); exact normalization.
    y = (logits + g_ref[...]) * itemp_ref[0]
    y = jnp.exp(y - jnp.max(y, axis=-1, keepdims=True))
    enc = y / jnp.sum(y, axis=-1, keepdims=True)               # (TM, Gp) f32
    if return_feat:
        enc_ref[...] = enc.astype(enc_ref.dtype)

    # decode: decoders[0] applied to every position (position_dependent=False).
    out = jnp.dot(enc.astype(wd_ref.dtype), wd_ref[...],
                  preferred_element_type=jnp.float32) + bd_ref[...]
    out_ref[...] = out.astype(out_ref.dtype)


# -----------------------------------------------------------------------------
# Parameter preparation (one-time): pad to lane-dense 128 multiples, cast
# weights to the compute dtype.  Hoisted out of the per-call hot path.
# -----------------------------------------------------------------------------
def _round_up(n, m):
    return ((n + m - 1) // m) * m


def _pad_to(a, shape, fill=0.0, dtype=None):
    dtype = a.dtype if dtype is None else dtype
    pads = [(0, s - d) for d, s in zip(a.shape, shape)]
    return jnp.pad(a.astype(dtype), pads, constant_values=fill)


def prepare_params(params, compute_dtype=jnp.bfloat16):
    """Pads / casts raw GumbelMLP params once; reuse across forward calls."""
    D, K = params["w1"].shape
    G = params["wb"].shape[1]
    C = params["wd"].shape[1]
    Dp, Kp, Gp, Cp = (_round_up(d, 128) for d in (D, K, G, C))
    return {
        "w1": _pad_to(params["w1"], (Dp, Kp), dtype=compute_dtype),
        "w2": _pad_to(params["w2"], (Kp, Kp), dtype=compute_dtype),
        "wb": _pad_to(params["wb"], (Kp, Gp), dtype=compute_dtype),
        "wd": _pad_to(params["wd"], (Gp, Cp), dtype=compute_dtype),
        "b1": _pad_to(params["b1"][None, :], (1, Kp), dtype=jnp.float32),
        "b2": _pad_to(params["b2"][None, :], (1, Kp), dtype=jnp.float32),
        "bb": _pad_to(params["bb"][None, :], (1, Gp), fill=_NEG_PAD,
                      dtype=jnp.float32),
        "bd": _pad_to(params["bd"][None, :], (1, Cp), dtype=jnp.float32),
        "dims": (D, K, G, C),
        "compute_dtype": compute_dtype,
    }


# -----------------------------------------------------------------------------
# Forward wrapper: row-tiled pallas_call over the flattened (B*T, D) input.
# -----------------------------------------------------------------------------
def gumbel_mlp_forward(prep, x, *, key, temp=1.0, num_sample=1, masks=None,
                       return_feat=False, tm=512, vmem_limit_bytes=None):
    """JAX/Pallas port of GumbelMLP.forward (num_sample=1, masks=None path).

    `prep` must come from prepare_params().  `tm` is the row-tile size:
    sweep 512-2048 on v6e, cap ~1024 on v5e (16 MiB scoped VMEM) and size so
    the grid has >=2 steps on v7x (2 TensorCores); pass vmem_limit_bytes when
    going above the scoped default.
    """
    if num_sample != 1:
        raise NotImplementedError  # TODO(synk): n>1 expand + sample-mean path
    if masks is not None:
        raise NotImplementedError  # TODO(synk): mask multiply on logits/enc/out
    # TODO(synk): position_dependent=True (per-position decoder weights) not
    # implemented; default module config uses only decoders[0].

    D, K, G, C = prep["dims"]
    compute_dtype = prep["compute_dtype"]
    B, T, Din = x.shape
    assert Din == D, f"input feature dim {Din} != expected {D}"

    Dp, Kp = prep["w1"].shape
    Gp = prep["wb"].shape[1]
    Cp = prep["wd"].shape[1]

    N = B * T
    tm = max(8, min(int(tm), _round_up(N, 8)))   # clamp tile to problem size
    Np = _round_up(N, tm)
    grid = (Np // tm,)

    # Single fused pad+cast pass over x; padded rows are garbage and sliced off.
    x_p = jnp.pad(x.reshape(N, D).astype(compute_dtype),
                  ((0, Np - N), (0, Dp - D)))
    # Gumbel(0,1) noise for the soft sample; fresh key per call is the
    # caller's responsibility (avoids correlated samples across steps).
    gumbel = jax.random.gumbel(key, (Np, Gp), dtype=jnp.float32)
    itemp = jnp.full((1,), 1.0 / float(temp), jnp.float32)

    row = lambda w: pl.BlockSpec((tm, w), lambda i: (i, 0))
    full = lambda shape: pl.BlockSpec(shape, lambda i: (0, 0))
    smem = pl.BlockSpec(memory_space=pltpu.MemorySpace.SMEM)

    # Primary outputs (f32); feature outputs (bf16) only when requested, so
    # the common path writes ~4x less HBM than the original 4x f32 version.
    out_shapes = [jax.ShapeDtypeStruct((Np, Gp), jnp.float32),   # logits
                  jax.ShapeDtypeStruct((Np, Cp), jnp.float32)]   # out
    out_specs = [row(Gp), row(Cp)]
    if return_feat:
        out_shapes += [jax.ShapeDtypeStruct((Np, Gp), jnp.bfloat16),  # enc
                       jax.ShapeDtypeStruct((Np, Kp), jnp.bfloat16)]  # embed
        out_specs += [row(Gp), row(Kp)]

    kernel = functools.partial(_gumbel_mlp_kernel, return_feat=return_feat)

    results = pl.pallas_call(
        kernel,
        out_shape=tuple(out_shapes),
        grid=grid,
        in_specs=[smem,                               # 1/temp (SMEM scalar)
                  row(Dp),                            # x row tile
                  row(Gp),                            # gumbel noise row tile
                  full((Dp, Kp)), full((1, Kp)),      # mlp layer 1
                  full((Kp, Kp)), full((1, Kp)),      # mlp layer 2
                  full((Kp, Gp)), full((1, Gp)),      # bottleneck
                  full((Gp, Cp)), full((1, Cp))],     # decoder[0]
        out_specs=tuple(out_specs),
        compiler_params=pltpu.CompilerParams(
            dimension_semantics=("parallel",),        # rows are independent
            vmem_limit_bytes=vmem_limit_bytes),
    )(itemp, x_p, gumbel,
      prep["w1"], prep["b1"], prep["w2"], prep["b2"],
      prep["wb"], prep["bb"], prep["wd"], prep["bd"])

    logits = results[0][:N, :G].reshape(B, T, G)
    out = results[1][:N, :C].reshape(B, T, C)
    if return_feat:
        encoding = results[2][:N, :G].reshape(B, T, G)
        embed = results[3][:N, :K].reshape(B, T, K)
        return logits, out, encoding, embed
    return logits, out


# -----------------------------------------------------------------------------
# Deterministic parameter construction (mirrors nn.Linear init; weights are
# stored pre-transposed as (in, out) so the kernel does row-major matmuls).
# -----------------------------------------------------------------------------
def make_params(key, input_size, embedding_dim, n_gumbel_units, n_class):
    D, K, G, C = input_size, embedding_dim, n_gumbel_units, n_class
    ks = jax.random.split(key, 8)

    def lin(k, fan_in, shape):
        bound = 1.0 / (fan_in ** 0.5)
        return jax.random.uniform(k, shape, jnp.float32, -bound, bound)

    return {
        "w1": lin(ks[0], D, (D, K)), "b1": lin(ks[1], D, (K,)),
        "w2": lin(ks[2], K, (K, K)), "b2": lin(ks[3], K, (K,)),
        "wb": lin(ks[4], K, (K, G)), "bb": lin(ks[5], K, (G,)),
        "wd": lin(ks[6], G, (G, C)), "bd": lin(ks[7], G, (C,)),
    }


if __name__ == "__main__":
    key = jax.random.PRNGKey(0)
    k_param, k_x, k_gumbel = jax.random.split(key, 3)

    # Small shapes consistent with the module defaults (n_gumbel_units=40,
    # n_class=65, input_size=80); T plays the role of max_len.
    B, T = 2, 16
    input_size, embedding_dim = 80, 64
    n_gumbel_units, n_class = 40, 65

    params = make_params(k_param, input_size, embedding_dim,
                         n_gumbel_units, n_class)
    prep = prepare_params(params)                       # one-time pad/cast
    x = jax.random.normal(k_x, (B, T, input_size), dtype=jnp.float32)

    # return_feat=True path (4 outputs).
    logits, out, encoding, embed = gumbel_mlp_forward(
        prep, x, key=k_gumbel, temp=1.0, return_feat=True)
    jax.block_until_ready((logits, out, encoding, embed))

    # return_feat=False path (2-output kernel variant), same noise key.
    logits2, out2 = gumbel_mlp_forward(prep, x, key=k_gumbel, temp=1.0)
    jax.block_until_ready((logits2, out2))

    # Shape / sanity checks.
    assert logits.shape == (B, T, n_gumbel_units)
    assert out.shape == (B, T, n_class)
    assert encoding.shape == (B, T, n_gumbel_units)
    assert embed.shape == (B, T, embedding_dim)
    assert bool(jnp.isfinite(logits).all()) and bool(jnp.isfinite(out).all())
    assert bool(jnp.isfinite(encoding.astype(jnp.float32)).all())
    assert bool(jnp.isfinite(embed.astype(jnp.float32)).all())

    # Both kernel variants agree on the shared outputs.
    assert bool(jnp.allclose(logits, logits2, atol=1e-5, rtol=1e-5))
    assert bool(jnp.allclose(out, out2, atol=1e-5, rtol=1e-5))

    # Gumbel-softmax sample: nonnegative, rows sum to ~1 (bf16 storage).
    enc_f32 = encoding.astype(jnp.float32)
    row_sums = enc_f32.sum(-1)
    assert bool(jnp.all(enc_f32 >= 0.0))
    assert bool(jnp.all(jnp.abs(row_sums - 1.0) < 2e-2))

    # Deterministic pieces vs a pure-JAX f32 reference (loose tol for bf16 MXU).
    h1 = jnp.maximum(x @ params["w1"] + params["b1"], 0.0)
    h2 = jnp.maximum(h1 @ params["w2"] + params["b2"], 0.0)
    logits_ref = h2 @ params["wb"] + params["bb"]
    out_ref = enc_f32 @ params["wd"] + params["bd"]
    assert bool(jnp.allclose(embed.astype(jnp.float32), h2, atol=0.15, rtol=0.15))
    assert bool(jnp.allclose(logits, logits_ref, atol=0.15, rtol=0.15))
    assert bool(jnp.allclose(out, out_ref, atol=0.15, rtol=0.15))

    print("KERNEL_OK")
</pallas_src>

<mosaic_0001>
module attributes {stable_mosaic.version = 11 : i64} {
  func.func @_gumbel_mlp_kernel(%arg0: i32, %arg1: memref<1xf32, #tpu.memory_space<smem>>, %arg2: memref<32x128xbf16, #tpu.memory_space<vmem>>, %arg3: memref<32x128xf32, #tpu.memory_space<vmem>>, %arg4: memref<128x128xbf16, #tpu.memory_space<vmem>>, %arg5: memref<1x128xf32, #tpu.memory_space<vmem>>, %arg6: memref<128x128xbf16, #tpu.memory_space<vmem>>, %arg7: memref<1x128xf32, #tpu.memory_space<vmem>>, %arg8: memref<128x128xbf16, #tpu.memory_space<vmem>>, %arg9: memref<1x128xf32, #tpu.memory_space<vmem>>, %arg10: memref<128x128xbf16, #tpu.memory_space<vmem>>, %arg11: memref<1x128xf32, #tpu.memory_space<vmem>>, %arg12: memref<32x128xf32, #tpu.memory_space<vmem>>, %arg13: memref<32x128xf32, #tpu.memory_space<vmem>>, %arg14: memref<32x128xbf16, #tpu.memory_space<vmem>>, %arg15: memref<32x128xbf16, #tpu.memory_space<vmem>>) attributes {dimension_semantics = [#tpu.dimension_semantics<parallel>], iteration_bounds = array<i64: 1>, scalar_prefetch = 0 : i64, scratch_operands = 0 : i64, tpu.core_type = #tpu.core_type<tc>, window_params = [{transform_indices = @transform_0, window_bounds = array<i64: 1>}, {transform_indices = @transform_1, window_bounds = array<i64: 32, 128>}, {transform_indices = @transform_2, window_bounds = array<i64: 32, 128>}, {pipeline_mode = #tpu.pipeline_mode<synchronous>, transform_indices = @transform_3, window_bounds = array<i64: 128, 128>}, {pipeline_mode = #tpu.pipeline_mode<synchronous>, transform_indices = @transform_4, window_bounds = array<i64: 1, 128>}, {pipeline_mode = #tpu.pipeline_mode<synchronous>, transform_indices = @transform_5, window_bounds = array<i64: 128, 128>}, {pipeline_mode = #tpu.pipeline_mode<synchronous>, transform_indices = @transform_6, window_bounds = array<i64: 1, 128>}, {pipeline_mode = #tpu.pipeline_mode<synchronous>, transform_indices = @transform_7, window_bounds = array<i64: 128, 128>}, {pipeline_mode = #tpu.pipeline_mode<synchronous>, transform_indices = @transform_8, window_bounds = array<i64: 1, 128>}, {pipeline_mode = #tpu.pipeline_mode<synchronous>, transform_indices = @transform_9, window_bounds = array<i64: 128, 128>}, {pipeline_mode = #tpu.pipeline_mode<synchronous>, transform_indices = @transform_10, window_bounds = array<i64: 1, 128>}, {transform_indices = @transform_11, window_bounds = array<i64: 32, 128>}, {transform_indices = @transform_12, window_bounds = array<i64: 32, 128>}, {transform_indices = @transform_13, window_bounds = array<i64: 32, 128>}, {transform_indices = @transform_14, window_bounds = array<i64: 32, 128>}]} {
    %c0 = arith.constant 0 : index
    %c0_0 = arith.constant 0 : index
    %0 = vector.load %arg2[%c0, %c0_0] : memref<32x128xbf16, #tpu.memory_space<vmem>>, vector<32x128xbf16>
    %c0_1 = arith.constant 0 : index
    %c0_2 = arith.constant 0 : index
    %1 = vector.load %arg4[%c0_1, %c0_2] : memref<128x128xbf16, #tpu.memory_space<vmem>>, vector<128x128xbf16>
    %cst = arith.constant dense<0.000000e+00> : vector<32x128xf32>
    %2 = tpu.matmul %0, %1, %cst {dimension_numbers = #tpu.dot_dimension_numbers<[1], [0], [0], [1], [0, 0, 1, 1], [], []>} : vector<32x128xbf16>, vector<128x128xbf16>, vector<32x128xf32> -> vector<32x128xf32>
    %c0_3 = arith.constant 0 : index
    %c0_4 = arith.constant 0 : index
    %3 = vector.load %arg5[%c0_3, %c0_4] : memref<1x128xf32, #tpu.memory_space<vmem>>, vector<1x128xf32>
    %4 = vector.broadcast %3 : vector<1x128xf32> to vector<32x128xf32>
    %5 = arith.addf %2, %4 : vector<32x128xf32>
    %cst_5 = arith.constant 0.000000e+00 : f32
    %6 = vector.broadcast %cst_5 : f32 to vector<32x128xf32>
    %7 = arith.maximumf %5, %6 : vector<32x128xf32>
    %8 = arith.truncf %7 : vector<32x128xf32> to vector<32x128xbf16>
    %c0_6 = arith.constant 0 : index
    %c0_7 = arith.constant 0 : index
    %9 = vector.load %arg6[%c0_6, %c0_7] : memref<128x128xbf16, #tpu.memory_space<vmem>>, vector<128x128xbf16>
    %cst_8 = arith.constant dense<0.000000e+00> : vector<32x128xf32>
    %10 = tpu.matmul %8, %9, %cst_8 {dimension_numbers = #tpu.dot_dimension_numbers<[1], [0], [0], [1], [0, 0, 1, 1], [], []>} : vector<32x128xbf16>, vector<128x128xbf16>, vector<32x128xf32> -> vector<32x128xf32>
    %c0_9 = arith.constant 0 : index
    %c0_10 = arith.constant 0 : index
    %11 = vector.load %arg7[%c0_9, %c0_10] : memref<1x128xf32, #tpu.memory_space<vmem>>, vector<1x128xf32>
    %12 = vector.broadcast %11 : vector<1x128xf32> to vector<32x128xf32>
    %13 = arith.addf %10, %12 : vector<32x128xf32>
    %cst_11 = arith.constant 0.000000e+00 : f32
    %14 = vector.broadcast %cst_11 : f32 to vector<32x128xf32>
    %15 = arith.maximumf %13, %14 : vector<32x128xf32>
    %16 = arith.truncf %15 : vector<32x128xf32> to vector<32x128xbf16>
    %c0_12 = arith.constant 0 : index
    %c0_13 = arith.constant 0 : index
    %17 = vector.load %arg15[%c0_12, %c0_13] : memref<32x128xbf16, #tpu.memory_space<vmem>>, vector<32x128xbf16>
    tpu.vector_store %arg15[%c0_12, %c0_13], %16 {strides = array<i32>} : memref<32x128xbf16, #tpu.memory_space<vmem>>, vector<32x128xbf16>,
    %18 = arith.truncf %15 : vector<32x128xf32> to vector<32x128xbf16>
    %c0_14 = arith.constant 0 : index
    %c0_15 = arith.constant 0 : index
    %19 = vector.load %arg8[%c0_14, %c0_15] : memref<128x128xbf16, #tpu.memory_space<vmem>>, vector<128x128xbf16>
    %cst_16 = arith.constant dense<0.000000e+00> : vector<32x128xf32>
    %20 = tpu.matmul %18, %19, %cst_16 {dimension_numbers = #tpu.dot_dimension_numbers<[1], [0], [0], [1], [0, 0, 1, 1], [], []>} : vector<32x128xbf16>, vector<128x128xbf16>, vector<32x128xf32> -> vector<32x128xf32>
    %c0_17 = arith.constant 0 : index
    %c0_18 = arith.constant 0 : index
    %21 = vector.load %arg9[%c0_17, %c0_18] : memref<1x128xf32, #tpu.memory_space<vmem>>, vector<1x128xf32>
    %22 = vector.broadcast %21 : vector<1x128xf32> to vector<32x128xf32>
    %23 = arith.addf %20, %22 : vector<32x128xf32>
    %c0_19 = arith.constant 0 : index
    %c0_20 = arith.constant 0 : index
    %24 = vector.load %arg12[%c0_19, %c0_20] : memref<32x128xf32, #tpu.memory_space<vmem>>, vector<32x128xf32>
    tpu.vector_store %arg12[%c0_19, %c0_20], %23 {strides = array<i32>} : memref<32x128xf32, #tpu.memory_space<vmem>>, vector<32x128xf32>,
    %c0_21 = arith.constant 0 : index
    %c0_22 = arith.constant 0 : index
    %25 = vector.load %arg3[%c0_21, %c0_22] : memref<32x128xf32, #tpu.memory_space<vmem>>, vector<32x128xf32>
    %26 = arith.addf %23, %25 : vector<32x128xf32>
    %c0_23 = arith.constant 0 : index
    %27 = memref.load %arg1[%c0_23] : memref<1xf32, #tpu.memory_space<smem>>
    %28 = vector.broadcast %27 : f32 to vector<32x128xf32>
    %29 = arith.mulf %26, %28 : vector<32x128xf32>
    %cst_24 = arith.constant dense<0xFF800000> : vector<32xf32>
    %30 = vector.multi_reduction <maximumf>, %29, %cst_24 [1] : vector<32x128xf32> to vector<32xf32>
    %31 = vector.shape_cast %30 : vector<32xf32> to vector<32x1xf32>
    %32 = vector.broadcast %31 : vector<32x1xf32> to vector<32x128xf32>
    %33 = arith.subf %29, %32 : vector<32x128xf32>
    %34 = math.exp %33 : vector<32x128xf32>
    %cst_25 = arith.constant dense<0.000000e+00> : vector<32xf32>
    %35 = vector.multi_reduction <add>, %34, %cst_25 [1] : vector<32x128xf32> to vector<32xf32>
    %36 = vector.shape_cast %35 : vector<32xf32> to vector<32x1xf32>
    %37 = vector.broadcast %36 : vector<32x1xf32> to vector<32x128xf32>
    %38 = arith.divf %34, %37 : vector<32x128xf32>
    %39 = arith.truncf %38 : vector<32x128xf32> to vector<32x128xbf16>
    %c0_26 = arith.constant 0 : index
    %c0_27 = arith.constant 0 : index
    %40 = vector.load %arg14[%c0_26, %c0_27] : memref<32x128xbf16, #tpu.memory_space<vmem>>, vector<32x128xbf16>
    tpu.vector_store %arg14[%c0_26, %c0_27], %39 {strides = array<i32>} : memref<32x128xbf16, #tpu.memory_space<vmem>>, vector<32x128xbf16>,
    %41 = arith.truncf %38 : vector<32x128xf32> to vector<32x128xbf16>
    %c0_28 = arith.constant 0 : index
    %c0_29 = arith.constant 0 : index
    %42 = vector.load %arg10[%c0_28, %c0_29] : memref<128x128xbf16, #tpu.memory_space<vmem>>, vector<128x128xbf16>
    %cst_30 = arith.constant dense<0.000000e+00> : vector<32x128xf32>
    %43 = tpu.matmul %41, %42, %cst_30 {dimension_numbers = #tpu.dot_dimension_numbers<[1], [0], [0], [1], [0, 0, 1, 1], [], []>} : vector<32x128xbf16>, vector<128x128xbf16>, vector<32x128xf32> -> vector<32x128xf32>
    %c0_31 = arith.constant 0 : index
    %c0_32 = arith.constant 0 : index
    %44 = vector.load %arg11[%c0_31, %c0_32] : memref<1x128xf32, #tpu.memory_space<vmem>>, vector<1x128xf32>
    %45 = vector.broadcast %44 : vector<1x128xf32> to vector<32x128xf32>
    %46 = arith.addf %43, %45 : vector<32x128xf32>
    %c0_33 = arith.constant 0 : index
    %c0_34 = arith.constant 0 : index
    %47 = vector.load %arg13[%c0_33, %c0_34] : memref<32x128xf32, #tpu.memory_space<vmem>>, vector<32x128xf32>
    tpu.vector_store %arg13[%c0_33, %c0_34], %46 {strides = array<i32>} : memref<32x128xf32, #tpu.memory_space<vmem>>, vector<32x128xf32>,
    return
  }
  func.func @transform_0(%arg0: i32) -> i32 {
    %c0_i32 = arith.constant 0 : i32
    %c0_i32_0 = arith.constant 0 : i32
    return %c0_i32 : i32
  }
  func.func @transform_1(%arg0: i32) -> (i32, i32) {
    %c0_i32 = arith.constant 0 : i32
    %c0_i32_0 = arith.constant 0 : i32
    return %arg0, %c0_i32 : i32, i32
  }
  func.func @transform_2(%arg0: i32) -> (i32, i32) {
    %c0_i32 = arith.constant 0 : i32
    %c0_i32_0 = arith.constant 0 : i32
    return %arg0, %c0_i32 : i32, i32
  }
  func.func @transform_3(%arg0: i32) -> (i32, i32) {
    %c0_i32 = arith.constant 0 : i32
    %c0_i32_0 = arith.constant 0 : i32
    %c0_i32_1 = arith.constant 0 : i32
    return %c0_i32, %c0_i32_0 : i32, i32
  }
  func.func @transform_4(%arg0: i32) -> (i32, i32) {
    %c0_i32 = arith.constant 0 : i32
    %c0_i32_0 = arith.constant 0 : i32
    %c0_i32_1 = arith.constant 0 : i32
    return %c0_i32, %c0_i32_0 : i32, i32
  }
  func.func @transform_5(%arg0: i32) -> (i32, i32) {
    %c0_i32 = arith.constant 0 : i32
    %c0_i32_0 = arith.constant 0 : i32
    %c0_i32_1 = arith.constant 0 : i32
    return %c0_i32, %c0_i32_0 : i32, i32
  }
  func.func @transform_6(%arg0: i32) -> (i32, i32) {
    %c0_i32 = arith.constant 0 : i32
    %c0_i32_0 = arith.constant 0 : i32
    %c0_i32_1 = arith.constant 0 : i32
    return %c0_i32, %c0_i32_0 : i32, i32
  }
  func.func @transform_7(%arg0: i32) -> (i32, i32) {
    %c0_i32 = arith.constant 0 : i32
    %c0_i32_0 = arith.constant 0 : i32
    %c0_i32_1 = arith.constant 0 : i32
    return %c0_i32, %c0_i32_0 : i32, i32
  }
  func.func @transform_8(%arg0: i32) -> (i32, i32) {
    %c0_i32 = arith.constant 0 : i32
    %c0_i32_0 = arith.constant 0 : i32
    %c0_i32_1 = arith.constant 0 : i32
    return %c0_i32, %c0_i32_0 : i32, i32
  }
  func.func @transform_9(%arg0: i32) -> (i32, i32) {
    %c0_i32 = arith.constant 0 : i32
    %c0_i32_0 = arith.constant 0 : i32
    %c0_i32_1 = arith.constant 0 : i32
    return %c0_i32, %c0_i32_0 : i32, i32
  }
  func.func @transform_10(%arg0: i32) -> (i32, i32) {
    %c0_i32 = arith.constant 0 : i32
    %c0_i32_0 = arith.constant 0 : i32
    %c0_i32_1 = arith.constant 0 : i32
    return %c0_i32, %c0_i32_0 : i32, i32
  }
  func.func @transform_11(%arg0: i32) -> (i32, i32) {
    %c0_i32 = arith.constant 0 : i32
    %c0_i32_0 = arith.constant 0 : i32
    return %arg0, %c0_i32 : i32, i32
  }
  func.func @transform_12(%arg0: i32) -> (i32, i32) {
    %c0_i32 = arith.constant 0 : i32
    %c0_i32_0 = arith.constant 0 : i32
    return %arg0, %c0_i32 : i32, i32
  }
  func.func @transform_13(%arg0: i32) -> (i32, i32) {
    %c0_i32 = arith.constant 0 : i32
    %c0_i32_0 = arith.constant 0 : i32
    return %arg0, %c0_i32 : i32, i32
  }
  func.func @transform_14(%arg0: i32) -> (i32, i32) {
    %c0_i32 = arith.constant 0 : i32
    %c0_i32_0 = arith.constant 0 : i32
    return %arg0, %c0_i32 : i32, i32
  }
}

</mosaic_0001>

<bundles_post_ra>
// kernel: tpu_custom_call.1
= control target key start
LH: loop header
LB: loop body
LE: loop exit
PB: predicated region body
PF: predicated region fallthrough
CT: control target
= control target key end

     0   :  { %21 = vsyncpa [#allocation4], 0  ;;  %s1399_s0 = inlined_call_operand.<no memory space> [shape: f32[1], index: 0, kind: input, shape index: {}]   ;;  %s1400_s1 = inlined_call_operand.hbm [shape: bf16[32,128], index: 1, kind: input, shape index: {}]   ;;  %s1401_s2 = inlined_call_operand.hbm [shape: f32[32,128], index: 2, kind: input, shape index: {}]   ;;  %s1402_s3 = inlined_call_operand.hbm [shape: bf16[128,128], index: 3, kind: input, shape index: {}]   ;;  %s1403_s4 = inlined_call_operand.vmem [shape: f32[1,128], index: 4, kind: input, shape index: {}]   ;;  %s1404_s5 = inlined_call_operand.hbm [shape: bf16[128,128], index: 5, kind: input, shape index: {}]   ;;  %s1405_s6 = inlined_call_operand.vmem [shape: f32[1,128], index: 6, kind: input, shape index: {}]   ;;  %s1406_s7 = inlined_call_operand.hbm [shape: bf16[128,128], index: 7, kind: input, shape index: {}]   ;;  %s1407_s8 = inlined_call_operand.vmem [shape: f32[1,128], index: 8, kind: input, shape index: {}]   ;;  %s1408_s9 = inlined_call_operand.hbm [shape: bf16[128,128], index: 9, kind: input, shape index: {}]   ;;  %s1409_s10 = inlined_call_operand.vmem [shape: f32[1,128], index: 10, kind: input, shape index: {}]   ;;  %s1410_s11 = inlined_call_operand.hbm [shape: f32[32,128], index: 11, kind: output, shape index: {0}]   ;;  %s1411_s12 = inlined_call_operand.hbm [shape: f32[32,128], index: 12, kind: output, shape index: {1}]   ;;  %s1412_s13 = inlined_call_operand.hbm [shape: bf16[32,128], index: 13, kind: output, shape index: {2}]   ;;  %s1413_s14 = inlined_call_operand.hbm [shape: bf16[32,128], index: 14, kind: output, shape index: {3}]  }
   0x1   :  { %22 = vsyncpa [#allocation7], 0 }
   0x2   :  { %23 = vsyncpa [#allocation10], 0 }
   0x3   :  { %24 = vsyncpa [#allocation13], 0 }
   0x4   :  { %25 = vsyncpa [#allocation5], 0 }
   0x5   :  { %26 = vsyncpa [#allocation16], 0  ;;  %s47_s15 = sshll.u32 %s1401_s2, 4  ;;  %s48_s15 = int_to_ptr.hbm [resolvable:$true] %s47_s15 }
   0x6   :  { %27 = vsyncpa [#allocation19], 0  ;;  %s1219_s16 = smov [#allocation6]   ;;  %s1220_s18 = smov 128  }
   0x7   :  { %s49_s17 = sshll.u32 %s1219_s16, 4  ;;  %s1221_s19 = smov 8   ;;  %s50_s17 = int_to_ptr.vmem [resolvable:$true] %s49_s17 }
   0x8   :  { %55 = dma.hbm_to_vmem [thread:$0]  %s48_s15, 512, %s50_s17, [#allocation7], %s1220_s18, %s1220_s18, %s1221_s19  }
   0x9   :  { %s75_s22 = sshll.u32 %s1404_s5, 4  ;;  %s1222_s23 = smov [#allocation9]   ;;  %s76_s22 = int_to_ptr.hbm [resolvable:$true] %s75_s22 }
   0xa   :  { %s77_s24 = sshll.u32 %s1222_s23, 4  ;;  %s34_s26 = sshll.u32 %s1400_s1, 4  ;;  %s78_s24 = int_to_ptr.vmem [resolvable:$true] %s77_s24  ;;  %s35_s26 = int_to_ptr.hbm [resolvable:$true] %s34_s26 }
   0xb   :  { %s1223_s27 = smov 64   ;;  %s1224_s28 = smov 4  }
   0xc   :  { %83 = dma.hbm_to_vmem [thread:$0]  %s76_s22, 1024, %s78_s24, [#allocation10], %s1223_s27, %s1223_s27, %s1224_s28  }
   0xd   :  { %s60_s15 = sshll.u32 %s1402_s3, 4  ;;  %s1225_s5 = smov [#allocation3]   ;;  %s61_s15 = int_to_ptr.hbm [resolvable:$true] %s60_s15 }
   0xe   :  { %s36_s16 = sshll.u32 %s1225_s5, 4  ;;  %s1226_s1 = smov [#allocation8]   ;;  %s37_s16 = int_to_ptr.vmem [resolvable:$true] %s36_s16 }
   0xf   :  { %42 = dma.hbm_to_vmem [thread:$0]  %s35_s26, 256, %s37_s16, [#allocation4], %s1223_s27, %s1223_s27, %s1224_s28  }
  0x10   :  { %s62_s17 = sshll.u32 %s1226_s1, 4  ;;  %s90_s23 = sshll.u32 %s1406_s7, 4  ;;  %s63_s17 = int_to_ptr.vmem [resolvable:$true] %s62_s17  ;;  %s91_s23 = int_to_ptr.hbm [resolvable:$true] %s90_s23 }
  0x11   :  { %68 = dma.hbm_to_vmem [thread:$0]  %s61_s15, 1024, %s63_s17, [#allocation7], %s1223_s27, %s1223_s27, %s1224_s28  }
  0x12   :  { %s105_s24 = sshll.u32 %s1408_s9, 4  ;;  %s1227_s25 = smov [#allocation11]   ;;  %s106_s24 = int_to_ptr.hbm [resolvable:$true] %s105_s24 }
  0x13   :  { %s92_s2 = sshll.u32 %s1227_s25, 4  ;;  %s1228_s26 = smov [#allocation12]   ;;  %s93_s2 = int_to_ptr.vmem [resolvable:$true] %s92_s2 }
  0x14   :  { %98 = dma.hbm_to_vmem [thread:$0]  %s91_s23, 1024, %s93_s2, [#allocation10], %s1223_s27, %s1223_s27, %s1224_s28  }
  0x15   :  { %s107_s7 = sshll.u32 %s1228_s26, 4  ;;  %s108_s7 = int_to_ptr.vmem [resolvable:$true] %s107_s7 }
  0x16   :  { %113 = dma.hbm_to_vmem [thread:$0]  %s106_s24, 1024, %s108_s7, [#allocation13], %s1223_s27, %s1223_s27, %s1224_s28  }
  0x17   :  { %1205 = dma.done.wait [#allocation4], 256  }
  0x18   :  { %1206 = vsyncadd [#allocation4], 4294967040 }
  0x19   :  { %1207 = dma.done.wait [#allocation7], 1536  }
  0x1a   :  { %1208 = vsyncadd [#allocation7], 4294965760 }
  0x1b   :  { %1209 = dma.done.wait [#allocation10], 2048  }
  0x1c   :  { %1210 = vsyncadd [#allocation10], 4294965248 }
  0x1d   :  { %1211 = dma.done.wait [#allocation13], 1024  }
  0x1e   :  { %1212 = vsyncadd [#allocation13], 4294966272  ;;  %v884_v0 = vld [vmem:[#allocation8 + $0x38] sm:$0xff]  ;;  %v883_v1 = vld [vmem:[#allocation8 + $0x30] sm:$0xff]  ;;  %s670_s1 = sshll.u32 %s1410_s11, 4  ;;  %s1229_s17 = smov [#allocation14]   ;;  %s671_s1 = int_to_ptr.hbm [resolvable:$true] %s670_s1 }
  0x1f   :  { %224 = vmatpush.bf16.msra.mxu0 %v884_v0  ;;  %v882_v2 = vld [vmem:[#allocation8 + $0x28] sm:$0xff]  ;;  %v881_v3 = vld [vmem:[#allocation8 + $0x20] sm:$0xff]  ;;  %v880_v4 = vld [vmem:[#allocation8 + $0x18] sm:$0xff]  ;;  %s668_s20 = sshll.u32 %s1229_s17, 4  ;;  %s709_s3 = sshll.u32 %s1413_s14, 4  ;;  %s669_s20 = int_to_ptr.vmem [resolvable:$true] %s668_s20  ;;  %s710_s3 = int_to_ptr.hbm [resolvable:$true] %s709_s3 }
  0x20   :  { %v892_v5 = vld [vmem:[#allocation9 + $0x38] sm:$0xff]  ;;  %v879_v6 = vld [vmem:[#allocation8 + $0x10] sm:$0xff]  ;;  %v878_v8 = vld [vmem:[#allocation8 + $0x8] sm:$0xff]  ;;  %s1230_s22 = smov [#allocation18]   ;;  %s1231_s14 = smov [#allocation15]  }
  0x21   :  { %317 = vmatpush.bf16.msra.mxu1 %v892_v5  ;;  %v891_v7 = vld [vmem:[#allocation9 + $0x30] sm:$0xff]  ;;  %v890_v9 = vld [vmem:[#allocation9 + $0x28] sm:$0xff]  ;;  %v877_v10 = vld [vmem:[#allocation8] sm:$0xff]  ;;  %s707_s24 = sshll.u32 %s1230_s22, 4  ;;  %s681_s2 = sshll.u32 %s1231_s14, 4  ;;  %s708_s24 = int_to_ptr.vmem [resolvable:$true] %s707_s24  ;;  %s682_s2 = int_to_ptr.vmem [resolvable:$true] %s681_s2 }
  0x22   :  { %v889_v11 = vld [vmem:[#allocation9 + $0x20] sm:$0xff]  ;;  %v875_v12 = vld [vmem:[#allocation3] sm:$0xff]  ;;  %v876_v13 = vld [vmem:[#allocation3 + $0x8] sm:$0xff]  ;;  %s683_s9 = sshll.u32 %s1411_s12, 4  ;;  %s1232_s29 = smov [#allocation17]   ;;  %s684_s9 = int_to_ptr.hbm [resolvable:$true] %s683_s9 }
  0x23   :  { %225 = vmatpush.bf16.msra.mxu0 %v883_v1  ;;  %v888_v14 = vld [vmem:[#allocation9 + $0x18] sm:$0xff]  ;;  %v887_v15 = vld [vmem:[#allocation9 + $0x10] sm:$0xff]  ;;  %v886_v16 = vld [vmem:[#allocation9 + $0x8] sm:$0xff] }
  0x24   :  { %v885_v17 = vld [vmem:[#allocation9] sm:$0xff]  ;;  %v900_v18 = vld [vmem:[#allocation11 + $0x38] sm:$0xff]  ;;  %v899_v20 = vld [vmem:[#allocation11 + $0x30] sm:$0xff] }
  0x25   :  { %318 = vmatpush.bf16.msra.mxu1 %v891_v7  ;;  %428 = vmatpush.bf16.msra.mxu2 %v900_v18  ;;  %v945_v21 = vld [vmem:[%s1403_s4] ss:$0 sm:$0xff]  ;;  %v898_v22 = vld [vmem:[#allocation11 + $0x28] sm:$0xff]  ;;  %v897_v36 = vld [vmem:[#allocation11 + $0x20] sm:$0xff]  ;;  %s694_s4 = sshll.u32 %s1232_s29, 4  ;;  %s695_s4 = int_to_ptr.vmem [resolvable:$true] %s694_s4 }
  0x26   :  { %v896_v37 = vld [vmem:[#allocation11 + $0x18] sm:$0xff]  ;;  %v895_v38 = vld [vmem:[#allocation11 + $0x10] sm:$0xff]  ;;  %v894_v39 = vld [vmem:[#allocation11 + $0x8] sm:$0xff] }
  0x27   :  { %226 = vmatpush.bf16.msra.mxu0 %v882_v2  ;;  %v893_v40 = vld [vmem:[#allocation11] sm:$0xff]  ;;  %v946_v41 = vld [vmem:[%s1405_s6] ss:$0 sm:$0xff] }
  0x28   :  { %v947_v2 = vld [vmem:[%s1407_s8] ss:$0 sm:$0xff] }
  0x29   :  { %319 = vmatpush.bf16.msra.mxu1 %v890_v9  ;;  %429 = vmatpush.bf16.msra.mxu2 %v899_v20  ;;  %v454_v20 = vld [vmem:[#allocation6 + $0x18] sm:$0xff] }
  0x2b   :  { %227 = vmatpush.bf16.msra.mxu0 %v881_v3 }
  0x2d   :  { %320 = vmatpush.bf16.msra.mxu1 %v889_v11  ;;  %430 = vmatpush.bf16.msra.mxu2 %v898_v22 }
  0x2f   :  { %228 = vmatpush.bf16.msra.mxu0 %v880_v4  ;;  %v451_v4 = vld [vmem:[#allocation6] sm:$0xff] }
  0x31   :  { %321 = vmatpush.bf16.msra.mxu1 %v888_v14  ;;  %431 = vmatpush.bf16.msra.mxu2 %v897_v36 }
  0x33   :  { %229 = vmatpush.bf16.msra.mxu0 %v879_v6  ;;  %v460_v6 = vstv %s1399_s0 }
  0x35   :  { %322 = vmatpush.bf16.msra.mxu1 %v887_v15  ;;  %432 = vmatpush.bf16.msra.mxu2 %v896_v37  ;;  %v453_v15 = vld [vmem:[#allocation6 + $0x10] sm:$0xff] }
  0x37   :  { %230 = vmatpush.bf16.msra.mxu0 %v878_v8 }
  0x39   :  { %323 = vmatpush.bf16.msra.mxu1 %v886_v16  ;;  %433 = vmatpush.bf16.msra.mxu2 %v895_v38 }
  0x3b   :  { %231 = vmatpush.bf16.msra.mxu0 %v877_v10  ;;  %v452_v10 = vld [vmem:[#allocation6 + $0x8] sm:$0xff] }
  0x3d   :  { %324 = vmatpush.bf16.msra.mxu1 %v885_v17  ;;  %434 = vmatpush.bf16.msra.mxu2 %v894_v39 }
  0x3e   :  { %232 = vmatmul.bf16.vlgmr.msra.gmra.mxu0 %v875_v12 }
  0x41   :  { %435 = vmatpush.bf16.msra.mxu2 %v893_v40  ;;  %v908_v40 = vld [vmem:[#allocation12 + $0x38] sm:$0xff] }
  0x42   :  { %641 = vmatpush.bf16.msra.mxu3 %v908_v40 }
  0x4e   :  { %237 = vmatmul.bf16.gmra.mxu0 %v876_v13 }
  0xbb   :  { %v233_v19 = vpop.f32.mrf.mxu0 }
  0xbc   :  { %v234_v23 = vadd.f32 %v945_v21, %v233_v19 }
  0xbe   :  { %v243_v26 = vmax.f32 %v234_v23, 0.0 }
  0xc3   :  { %v235_v24 = vpop.f32.mrf.mxu0 }
  0xc4   :  { %v236_v25 = vadd.f32 %v945_v21, %v235_v24 }
  0xc6   :  { %v244_v27 = vmax.f32 %v236_v25, 0.0 }
  0xc8   :  { %v247_v28 = vpack.c.bf16 %v244_v27, %v243_v26 }
  0xca   :  { %325 = vmatmul.bf16.vlgmr.msra.gmra.mxu1 %v247_v28 }
  0xcb   :  { %v238_v29 = vpop.f32.mrf.mxu0 }
  0xcc   :  { %v239_v30 = vadd.f32 %v945_v21, %v238_v29 }
  0xce   :  { %v245_v33 = vmax.f32 %v239_v30, 0.0 }
  0xd3   :  { %v240_v31 = vpop.f32.mrf.mxu0 }
  0xd4   :  { %v241_v32 = vadd.f32 %v945_v21, %v240_v31 }
  0xd6   :  { %v246_v34 = vmax.f32 %v241_v32, 0.0 }
  0xd8   :  { %v248_v35 = vpack.c.bf16 %v246_v34, %v245_v33 }
  0xda   :  { %330 = vmatmul.bf16.gmra.mxu1 %v248_v35 }
 0x147   :  { %v326_v42 = vpop.f32.mrf.mxu1 }
 0x148   :  { %v327_v43 = vadd.f32 %v946_v41, %v326_v42  ;;  %v906_v42 = vld [vmem:[#allocation12 + $0x28] sm:$0xff] }
 0x14a   :  { %v336_v44 = vmax.f32 %v327_v43, 0.0  ;;  %v905_v43 = vld [vmem:[#allocation12 + $0x20] sm:$0xff] }
 0x14c   :  { %v340_v47 = vpack.c.bf16 %v336_v44, %v336_v44 }
 0x14e   :  { %v372_v51 = vunpack.c.l.b16 %v340_v47  ;;  %v901_v47 = vld [vmem:[#allocation12] sm:$0xff] }
 0x14f   :  { %v328_v45 = vpop.f32.mrf.mxu1 }
 0x150   :  { %v329_v46 = vadd.f32 %v946_v41, %v328_v45  ;;  %v903_v45 = vld [vmem:[#allocation12 + $0x10] sm:$0xff] }
 0x152   :  { %v337_v48 = vmax.f32 %v329_v46, 0.0  ;;  %v902_v46 = vld [vmem:[#allocation12 + $0x8] sm:$0xff] }
 0x154   :  { %v341_v49 = vpack.c.bf16 %v337_v48, %v337_v48  ;;  %v912_v50 = vpack.c.bf16 %v337_v48, %v336_v44  ;;  %v904_v44 = vld [vmem:[#allocation12 + $0x18] sm:$0xff] }
 0x156   :  { %913 = vst [vmem:[#allocation18] sm:$0xff] %v912_v50   ;;  %v373_v52 = vunpack.c.l.b16 %v341_v49 }
 0x157   :  { %v331_v53 = vpop.f32.mrf.mxu1 }
 0x158   :  { %v376_v54 = vpack.c.b16 %v373_v52, %v372_v51  ;;  %v332_v55 = vadd.f32 %v946_v41, %v331_v53 }
 0x15a   :  { %436 = vmatmul.bf16.vlgmr.msra.gmra.mxu2 %v376_v54  ;;  %v338_v56 = vmax.f32 %v332_v55, 0.0 }
 0x15c   :  { %v342_v59 = vpack.c.bf16 %v338_v56, %v338_v56 }
 0x15e   :  { %v374_v63 = vunpack.c.l.b16 %v342_v59 }
 0x15f   :  { %v333_v57 = vpop.f32.mrf.mxu1 }
 0x160   :  { %v334_v58 = vadd.f32 %v946_v41, %v333_v57  ;;  %v907_v41 = vld [vmem:[#allocation12 + $0x30] sm:$0xff] }
 0x161   :  { %642 = vmatpush.bf16.msra.mxu3 %v907_v41 }
 0x162   :  { %v339_v60 = vmax.f32 %v334_v58, 0.0 }
 0x164   :  { %v343_v61 = vpack.c.bf16 %v339_v60, %v339_v60  ;;  %v917_v62 = vpack.c.bf16 %v339_v60, %v338_v56 }
 0x165   :  { %643 = vmatpush.bf16.msra.mxu3 %v906_v42 }
 0x166   :  { %929 = vst [vmem:[#allocation18 + $0x8] sm:$0xff] %v917_v62   ;;  %v375_v0 = vunpack.c.l.b16 %v343_v61 }
 0x167   :  { %715 = dma.vmem_to_hbm [thread:$0]  %s708_s24, 256, %s710_s3, [#allocation19], %s1223_s27, %s1223_s27, %s1224_s28  }
 0x168   :  { %v377_v1 = vpack.c.b16 %v375_v0, %v374_v63 }
 0x169   :  { %644 = vmatpush.bf16.msra.mxu3 %v905_v43 }
 0x16a   :  { %441 = vmatmul.bf16.gmra.mxu2 %v377_v1 }
 0x16d   :  { %645 = vmatpush.bf16.msra.mxu3 %v904_v44 }
 0x171   :  { %646 = vmatpush.bf16.msra.mxu3 %v903_v45 }
 0x175   :  { %647 = vmatpush.bf16.msra.mxu3 %v902_v46 }
 0x179   :  { %648 = vmatpush.bf16.msra.mxu3 %v901_v47 }
 0x1dd   :  { %v437_v3 = vpop.f32.mrf.mxu2 }
 0x1de   :  { %v438_v5 = vadd.f32 %v947_v2, %v437_v3 }
 0x1e0   :  { %447 = vst [vmem:[#allocation14] sm:$0xff] %v438_v5  ;;  %v455_v7 = vadd.f32 %v451_v4, %v438_v5 }
 0x1e2   :  { %v461_v8 = vmul.f32 %v460_v6, %v455_v7 }
 0x1e4   :  { %465 = vmax.xlane.f32.xlu0 %v461_v8 }
 0x1e5   :  { %v439_v9 = vpop.f32.mrf.mxu2 }
 0x1e6   :  { %v440_v11 = vadd.f32 %v947_v2, %v439_v9 }
 0x1e8   :  { %448 = vst [vmem:[#allocation14 + $0x8] sm:$0xff] %v440_v11  ;;  %v456_v12 = vadd.f32 %v452_v10, %v440_v11 }
 0x1ea   :  { %v462_v13 = vmul.f32 %v460_v6, %v456_v12 }
 0x1ec   :  { %467 = vmax.xlane.f32.xlu0 %v462_v13 }
 0x1ed   :  { %v442_v14 = vpop.f32.mrf.mxu2 }
 0x1ee   :  { %v443_v16 = vadd.f32 %v947_v2, %v442_v14 }
 0x1f0   :  { %449 = vst [vmem:[#allocation14 + $0x10] sm:$0xff] %v443_v16  ;;  %v457_v17 = vadd.f32 %v453_v15, %v443_v16 }
 0x1f2   :  { %v463_v18 = vmul.f32 %v460_v6, %v457_v17 }
 0x1f4   :  { %469 = vmax.xlane.f32.xlu1 %v463_v18 }
 0x1f5   :  { %v444_v19 = vpop.f32.mrf.mxu2 }
 0x1f6   :  { %v445_v21 = vadd.f32 %v947_v2, %v444_v19 }
 0x1f8   :  { %450 = vst [vmem:[#allocation14 + $0x18] sm:$0xff] %v445_v21  ;;  %v458_v22 = vadd.f32 %v454_v20, %v445_v21 }
 0x1f9   :  { %676 = dma.vmem_to_hbm [thread:$0]  %s669_s20, 512, %s671_s1, [#allocation5], %s1220_s18, %s1220_s18, %s1221_s19  }
 0x1fa   :  { %v464_v23 = vmul.f32 %v460_v6, %v458_v22 }
 0x1fc   :  { %471 = vmax.xlane.f32.xlu1 %v464_v23 }
 0x257   :  { %v466_v24 = vpop.xlane.xlu0 %465 }
 0x258   :  { %v473_v25 = vsub.f32 %v461_v8, %v466_v24 }
 0x25a   :  { %v477_v26 = vmul.f32 1.442695, %v473_v25 }
 0x25c   :  { %949 = vpow2.f32 %v477_v26 }
 0x25f   :  { %v468_v27 = vpop.xlane.xlu0 %467 }
 0x260   :  { %v474_v28 = vsub.f32 %v462_v13, %v468_v27 }
 0x262   :  { %v1356_v29 = vpop.eup %949  ;;  %v479_v30 = vmul.f32 1.442695, %v474_v28 }
 0x263   :  { %485 = vadd.xlane.f32.xlu2 %v1356_v29 }
 0x264   :  { %951 = vpow2.f32 %v479_v30 }
 0x267   :  { %v470_v31 = vpop.xlane.xlu1 %469 }
 0x268   :  { %v475_v32 = vsub.f32 %v463_v18, %v470_v31 }
 0x26a   :  { %v1359_v33 = vpop.eup %951  ;;  %v481_v34 = vmul.f32 1.442695, %v475_v32 }
 0x26b   :  { %487 = vadd.xlane.f32.xlu2 %v1359_v33 }
 0x26c   :  { %953 = vpow2.f32 %v481_v34 }
 0x26f   :  { %v472_v35 = vpop.xlane.xlu1 %471 }
 0x270   :  { %v476_v36 = vsub.f32 %v464_v23, %v472_v35 }
 0x272   :  { %v1362_v37 = vpop.eup %953  ;;  %v483_v38 = vmul.f32 1.442695, %v476_v36 }
 0x273   :  { %489 = vadd.xlane.f32.xlu0 %v1362_v37 }
 0x274   :  { %955 = vpow2.f32 %v483_v38 }
 0x27a   :  { %v1365_v39 = vpop.eup %955 }
 0x27b   :  { %491 = vadd.xlane.f32.xlu1 %v1365_v39 }
 0x2d6   :  { %v486_v48 = vpop.xlane.xlu2 %485 }
 0x2d7   :  { %957 = vrcp.f32 %v486_v48  ;;  %v504_v55 = vand.u32 2147483648, %v486_v48  ;;  %vm498_vm1 = vweird.f32 %v486_v48  ;;  %v502_v57 = vand.u32 2147483647, %v486_v48 }
 0x2d9   :  { %v505_v61 = vor.u32 1.1754944e-38, %v504_v55  ;;  %vm503_vm3 = vcmp.eq.f32.partialorder %v502_v57, 8.507059e+37 }
 0x2dd   :  { %v958_v49 = vpop.eup %957 }
 0x2de   :  { %v494_v50 = vmul.f32 %v958_v49, %v486_v48  ;;  %v488_v51 = vpop.xlane.xlu2 %487  ;;  %vm499_vm0 = vweird.f32 %v958_v49 }
 0x2df   :  { %959 = vrcp.f32 %v488_v51  ;;  %vm500_vm2 = vmor %vm498_vm1, %vm499_vm0  ;;  %v519_v0 = vand.u32 2147483648, %v488_v51  ;;  %v517_v2 = vand.u32 2147483647, %v488_v51  ;;  %vm513_vm5 = vweird.f32 %v488_v51 }
 0x2e0   :  { %v495_v52 = vsub.f32 1.0, %v494_v50 }
 0x2e1   :  { %v520_v7 = vor.u32 1.1754944e-38, %v519_v0  ;;  %vm518_vm7 = vcmp.eq.f32.partialorder %v517_v2, 8.507059e+37 }
 0x2e2   :  { %v496_v53 = vmul.f32 %v958_v49, %v495_v52 }
 0x2e4   :  { %v497_v54 = vadd.f32 %v958_v49, %v496_v53 }
 0x2e5   :  { %v960_v56 = vpop.eup %959 }
 0x2e6   :  { %v509_v58 = vmul.f32 %v960_v56, %v488_v51  ;;  %v490_v59 = vpop.xlane.xlu0 %489  ;;  %v501_v60 = vsel %vm500_vm2, %v958_v49, %v497_v54  ;;  %vm514_vm4 = vweird.f32 %v960_v56 }
 0x2e7   :  { %961 = vrcp.f32 %v490_v59  ;;  %v506_v1 = vsel %vm503_vm3, %v505_v61, %v501_v60  ;;  %vm515_vm6 = vmor %vm513_vm5, %vm514_vm4  ;;  %v534_v15 = vand.u32 2147483648, %v490_v59  ;;  %vm528_vm9 = vweird.f32 %v490_v59 }
 0x2e8   :  { %v510_v62 = vsub.f32 1.0, %v509_v58  ;;  %v507_v5 = vmul.f32 %v1356_v29, %v506_v1  ;;  %v532_v19 = vand.u32 2147483647, %v490_v59 }
 0x2e9   :  { %v535_v25 = vor.u32 1.1754944e-38, %v534_v15 }
 0x2ea   :  { %v511_v63 = vmul.f32 %v960_v56, %v510_v62  ;;  %v553_v13 = vpack.c.bf16 %v507_v5, %v507_v5  ;;  %vm533_vm11 = vcmp.eq.f32.partialorder %v532_v19, 8.507059e+37 }
 0x2ec   :  { %v512_v3 = vadd.f32 %v960_v56, %v511_v63  ;;  %v585_v21 = vunpack.c.l.b16 %v553_v13 }
 0x2ed   :  { %v962_v4 = vpop.eup %961 }
 0x2ee   :  { %v516_v6 = vsel %vm515_vm6, %v960_v56, %v512_v3  ;;  %v524_v8 = vmul.f32 %v962_v4, %v490_v59  ;;  %v492_v9 = vpop.xlane.xlu1 %491  ;;  %vm529_vm8 = vweird.f32 %v962_v4 }
 0x2ef   :  { %963 = vrcp.f32 %v492_v9  ;;  %v521_v11 = vsel %vm518_vm7, %v520_v7, %v516_v6  ;;  %vm530_vm10 = vmor %vm528_vm9, %vm529_vm8  ;;  %v549_v28 = vand.u32 2147483648, %v492_v9  ;;  %v547_v31 = vand.u32 2147483647, %v492_v9 }
 0x2f0   :  { %v525_v10 = vsub.f32 1.0, %v524_v8  ;;  %v522_v12 = vmul.f32 %v1359_v33, %v521_v11  ;;  %vm543_vm13 = vweird.f32 %v492_v9 }
 0x2f1   :  { %v550_v34 = vor.u32 1.1754944e-38, %v549_v28  ;;  %vm548_vm15 = vcmp.eq.f32.partialorder %v547_v31, 8.507059e+37 }
 0x2f2   :  { %v526_v14 = vmul.f32 %v962_v4, %v525_v10  ;;  %v554_v16 = vpack.c.bf16 %v522_v12, %v522_v12  ;;  %v922_v17 = vpack.c.bf16 %v522_v12, %v507_v5 }
 0x2f4   :  { %v527_v18 = vadd.f32 %v962_v4, %v526_v14  ;;  %v586_v22 = vunpack.c.l.b16 %v554_v16  ;;  %923 = vst [vmem:[#allocation17] sm:$0xff] %v922_v17  }
 0x2f5   :  { %v964_v20 = vpop.eup %963 }
 0x2f6   :  { %v531_v23 = vsel %vm530_vm10, %v962_v4, %v527_v18  ;;  %v539_v24 = vmul.f32 %v964_v20, %v492_v9  ;;  %v589_v26 = vpack.c.b16 %v586_v22, %v585_v21  ;;  %vm544_vm12 = vweird.f32 %v964_v20 }
 0x2f7   :  { %v536_v29 = vsel %vm533_vm11, %v535_v25, %v531_v23  ;;  %vm545_vm14 = vmor %vm543_vm13, %vm544_vm12 }
 0x2f8   :  { %v540_v27 = vsub.f32 1.0, %v539_v24  ;;  %649 = vmatmul.bf16.vlgmr.msra.gmra.mxu3 %v589_v26  ;;  %v537_v33 = vmul.f32 %v1362_v37, %v536_v29  ;;  %v948_v37 = vld [vmem:[%s1409_s10] ss:$0 sm:$0xff]  ;;  %s696_s10 = sshll.u32 %s1412_s13, 4  ;;  %s697_s10 = int_to_ptr.hbm [resolvable:$true] %s696_s10 }
 0x2fa   :  { %v541_v30 = vmul.f32 %v964_v20, %v540_v27  ;;  %v555_v40 = vpack.c.bf16 %v537_v33, %v537_v33 }
 0x2fc   :  { %v542_v32 = vadd.f32 %v964_v20, %v541_v30  ;;  %v587_v43 = vunpack.c.l.b16 %v555_v40 }
 0x2fe   :  { %v546_v35 = vsel %vm545_vm14, %v964_v20, %v542_v32 }
 0x2ff   :  { %v551_v36 = vsel %vm548_vm15, %v550_v34, %v546_v35 }
 0x300   :  { %v552_v38 = vmul.f32 %v1365_v39, %v551_v36 }
 0x302   :  { %v556_v41 = vpack.c.bf16 %v552_v38, %v552_v38  ;;  %v927_v42 = vpack.c.bf16 %v552_v38, %v537_v33 }
 0x304   :  { %v588_v44 = vunpack.c.l.b16 %v556_v41  ;;  %930 = vst [vmem:[#allocation17 + $0x8] sm:$0xff] %v927_v42  }
 0x306   :  { %v590_v45 = vpack.c.b16 %v588_v44, %v587_v43 }
 0x308   :  { %654 = vmatmul.bf16.gmra.mxu3 %v590_v45 }
 0x37b   :  { %v650_v39 = vpop.f32.mrf.mxu3 }
 0x37c   :  { %v651_v46 = vadd.f32 %v948_v37, %v650_v39 }
 0x37e   :  { %660 = vst [vmem:[#allocation15] sm:$0xff] %v651_v46 }
 0x383   :  { %v652_v47 = vpop.f32.mrf.mxu3 }
 0x384   :  { %v653_v48 = vadd.f32 %v948_v37, %v652_v47 }
 0x386   :  { %661 = vst [vmem:[#allocation15 + $0x8] sm:$0xff] %v653_v48 }
 0x38b   :  { %v655_v49 = vpop.f32.mrf.mxu3 }
 0x38c   :  { %v656_v50 = vadd.f32 %v948_v37, %v655_v49 }
 0x38e   :  { %662 = vst [vmem:[#allocation15 + $0x10] sm:$0xff] %v656_v50 }
 0x393   :  { %v657_v51 = vpop.f32.mrf.mxu3 }
 0x394   :  { %v658_v52 = vadd.f32 %v948_v37, %v657_v51 }
 0x396   :  { %663 = vst [vmem:[#allocation15 + $0x18] sm:$0xff] %v658_v52 }
 0x397   :  { %689 = dma.vmem_to_hbm [thread:$0]  %s682_s2, 512, %s684_s9, [#allocation16], %s1220_s18, %s1220_s18, %s1221_s19  }
 0x398   :  { %702 = dma.vmem_to_hbm [thread:$0]  %s695_s4, 256, %s697_s10, [#allocation16], %s1223_s27, %s1223_s27, %s1224_s28  }
 0x399   :  { %1213 = dma.done.wait [#allocation5], 512  }
 0x39a   :  { %1214 = vsyncadd [#allocation5], 4294966784 }
 0x39b   :  { %1215 = dma.done.wait [#allocation16], 768  }
 0x39c   :  { %1216 = vsyncadd [#allocation16], 4294966528 }
 0x39d   :  { %1217 = dma.done.wait [#allocation19], 256  }
 0x39e   :  { %1218 = vsyncadd [#allocation19], 4294967040 }
 0x39f   :  { %732 = vsyncpa [#allocation4], 1 }
 0x3a0   :  { %733 = vsyncpa [#allocation7], 1 }
 0x3a1   :  { %734 = vsyncpa [#allocation10], 1 }
 0x3a2   :  { %735 = vsyncpa [#allocation13], 1 }
 0x3a3   :  { %736 = vsyncpa [#allocation5], 1 }
 0x3a4   :  { %737 = vsyncpa [#allocation16], 1 }
 0x3a5   :  { %738 = vsyncpa [#allocation19], 1 }

</bundles_post_ra>
